<compile_context>
chip_gen: v6e
topology: v6e:2x2x1
jax: 0.10.0
libtpu: 0.0.40
codegen_flags: <defaults>
</compile_context>

<pallas_src>
import functools

import jax
import jax.numpy as jnp
from jax import lax
from jax.experimental import pallas as pl
from jax.experimental.pallas import tpu as pltpu

EPSILON = 1e-7
LANES = 128
TARGET_TILE_BYTES = 512 * 1024  # f32 bytes per input tile


def _choose_row_tiling(rows, width):
    """Return (tile_rows, padded_rows); tile_rows is a multiple of 8."""
    cap = max(8, ((TARGET_TILE_BYTES // (4 * width)) // 8) * 8)
    if rows <= cap:
        tile = ((rows + 7) // 8) * 8
        return tile, tile
    # Prefer a tile that divides rows exactly (no padding copy).
    for tile in range(cap, max(cap // 4, 8) - 1, -8):
        if rows % tile == 0:
            return tile, rows
    tile = cap
    return tile, ((rows + tile - 1) // tile) * tile


def _make_reduce_kernel(tile_rows, width, rows_true, needs_mask):
    """Pass 1: shifted sum / sum-of-squares reduction -> (scale, shift)."""
    n_total = float(rows_true * width)

    def kernel(x_ref, g_ref, b_ref, scale_ref, shift_ref, s1_acc, s2_acc, k_ref):
        step = pl.program_id(0)
        x = x_ref[...].astype(jnp.float32)                      # (tile_rows, W)

        if needs_mask:
            row_ids = (lax.broadcasted_iota(jnp.int32, (tile_rows, width), 0)
                       + step * tile_rows)
            valid = row_ids < rows_true

        @pl.when(step == 0)
        def _init():
            s1_acc[...] = jnp.zeros_like(s1_acc)
            s2_acc[...] = jnp.zeros_like(s2_acc)
            # Pilot value K ~ mean (from the first tile) so running sums stay
            # small and variance = E[d^2] - E[d]^2 does not cancel.
            if needs_mask:
                t0 = jnp.where(valid, x, 0.0)
                cnt0 = float(min(rows_true, tile_rows) * width)
            else:
                t0 = x
                cnt0 = float(tile_rows * width)
            k_ref[0] = jnp.sum(t0) / cnt0

        k = k_ref[0]
        d = x - k
        if needs_mask:
            d = jnp.where(valid, d, 0.0)

        # Per-(sublane, lane) partial accumulators: pure VALU adds per tile
        # (hidden under the HBM-bound pipeline); XLU reduce only on last step.
        s1_acc[...] += d.reshape(tile_rows // 8, 8, width).sum(axis=0)
        s2_acc[...] += (d * d).reshape(tile_rows // 8, 8, width).sum(axis=0)

        @pl.when(step == pl.num_programs(0) - 1)
        def _finalize():
            s1 = jnp.sum(s1_acc[...])
            s2 = jnp.sum(s2_acc[...])
            d_mean = s1 / n_total                     # small, since K ~= mean
            mean = k + d_mean
            variance = jnp.maximum(s2 / n_total - d_mean * d_mean, 0.0)
            inv_std = lax.rsqrt(variance + EPSILON)
            g = g_ref[...].astype(jnp.float32)        # (1, W)
            b = b_ref[...].astype(jnp.float32)        # (1, W)
            scale = g * inv_std
            scale_ref[...] = scale
            shift_ref[...] = b - mean * scale         # fold mean into bias

    return kernel


def _normalize_kernel(x_ref, scale_ref, shift_ref, o_ref):
    """Pass 2: out = x * scale + shift (one mul + one add per element)."""
    x = x_ref[...].astype(jnp.float32)
    o_ref[...] = (x * scale_ref[...] + shift_ref[...]).astype(o_ref.dtype)


@jax.jit
def instant_layer_norm(x, gamma, beta):
    """x: (B, T, C); gamma/beta: (1, 1, C). Returns (B, T, C)."""
    B, T, C = x.shape
    total = B * T * C

    # Pick a lane-dense 2-D layout whenever possible.
    if C % LANES == 0:
        width = C
        rows = total // width
        x2d = x.reshape(rows, width)
        g_vec = gamma.reshape(1, width)
        b_vec = beta.reshape(1, width)
    elif LANES % C == 0 and total % LANES == 0:
        width = LANES
        rows = total // width
        reps = LANES // C
        x2d = x.reshape(rows, width)
        g_vec = jnp.tile(gamma.reshape(1, C), (1, reps))  # lane l -> channel l % C
        b_vec = jnp.tile(beta.reshape(1, C), (1, reps))
    else:
        # TODO(synk): an lcm(C,128)-period gamma slab would make this case
        # lane-dense as well; for now channels sit directly in lanes.
        width = C
        rows = total // width  # == B * T
        x2d = x.reshape(rows, width)
        g_vec = gamma.reshape(1, width)
        b_vec = beta.reshape(1, width)

    tile_rows, padded_rows = _choose_row_tiling(rows, width)
    needs_mask = padded_rows != rows
    if needs_mask:
        x2d = jnp.pad(x2d, ((0, padded_rows - rows), (0, 0)))
    num_tiles = padded_rows // tile_rows

    reduce_kernel = _make_reduce_kernel(tile_rows, width, rows, needs_mask)

    # ---- Pass 1: global reduction -> per-lane scale / shift -----------------
    scale, shift = pl.pallas_call(
        reduce_kernel,
        out_shape=(jax.ShapeDtypeStruct((1, width), jnp.float32),
                   jax.ShapeDtypeStruct((1, width), jnp.float32)),
        grid_spec=pltpu.PrefetchScalarGridSpec(
            num_scalar_prefetch=0,
            grid=(num_tiles,),
            in_specs=[
                pl.BlockSpec((tile_rows, width), lambda i: (i, 0)),
                pl.BlockSpec((1, width), lambda i: (0, 0)),   # gamma: resident
                pl.BlockSpec((1, width), lambda i: (0, 0)),   # beta : resident
            ],
            out_specs=(pl.BlockSpec((1, width), lambda i: (0, 0)),
                       pl.BlockSpec((1, width), lambda i: (0, 0))),
            scratch_shapes=[
                pltpu.VMEM((8, width), jnp.float32),          # s1 partials
                pltpu.VMEM((8, width), jnp.float32),          # s2 partials
                pltpu.SMEM((1,), jnp.float32),                # pilot K
            ]),
        compiler_params=pltpu.CompilerParams(
            dimension_semantics=("arbitrary",)),
    )(x2d, g_vec, b_vec)

    # ---- Pass 2: normalize (elementwise, megacore-parallel, in-place) -------
    out2d = pl.pallas_call(
        _normalize_kernel,
        out_shape=jax.ShapeDtypeStruct((padded_rows, width), x.dtype),
        grid_spec=pltpu.PrefetchScalarGridSpec(
            num_scalar_prefetch=0,
            grid=(num_tiles,),
            in_specs=[
                pl.BlockSpec((tile_rows, width), lambda i: (i, 0)),
                pl.BlockSpec((1, width), lambda i: (0, 0)),
                pl.BlockSpec((1, width), lambda i: (0, 0)),
            ],
            out_specs=pl.BlockSpec((tile_rows, width), lambda i: (i, 0))),
        compiler_params=pltpu.CompilerParams(
            dimension_semantics=("parallel",)),
        input_output_aliases={0: 0},
    )(x2d, scale, shift)

    if needs_mask:
        out2d = out2d[:rows]
    return out2d.reshape(B, T, C)


def reference(x, gamma, beta):
    x32 = x.astype(jnp.float32)
    mean = jnp.mean(x32)
    sub = x32 - mean
    variance = jnp.mean(jnp.square(sub))
    std = jnp.sqrt(variance + EPSILON)
    return ((sub / std) * gamma + beta).astype(x.dtype)


if __name__ == "__main__":
    key = jax.random.PRNGKey(0)

    # Primary check: shapes consistent with the module (batch, seq, channels).
    B, T, C = 2, 8, 32
    x = jax.random.normal(key, (B, T, C), dtype=jnp.float32)
    gamma = (1.0 + 0.1 * jnp.arange(C, dtype=jnp.float32)).reshape(1, 1, C)
    beta = (0.01 * jnp.arange(C, dtype=jnp.float32)).reshape(1, 1, C)

    out = jax.block_until_ready(instant_layer_norm(x, gamma, beta))
    ref = reference(x, gamma, beta)
    assert out.shape == (B, T, C)
    assert jnp.allclose(out, ref, atol=1e-5, rtol=1e-5), "mismatch vs reference"

    # Secondary check: exercises the padded / masked-tail path.
    B2, T2, C2 = 2, 50, 32
    x2 = 3.0 + jax.random.normal(jax.random.PRNGKey(1), (B2, T2, C2),
                                 dtype=jnp.float32)   # nonzero mean
    g2 = (0.5 + 0.05 * jnp.arange(C2, dtype=jnp.float32)).reshape(1, 1, C2)
    b2 = (-0.02 * jnp.arange(C2, dtype=jnp.float32)).reshape(1, 1, C2)
    out2 = jax.block_until_ready(instant_layer_norm(x2, g2, b2))
    ref2 = reference(x2, g2, b2)
    assert jnp.allclose(out2, ref2, atol=1e-5, rtol=1e-5), "mismatch (padded path)"

    print("KERNEL_OK")
</pallas_src>

<mosaic_0001>
module attributes {stable_mosaic.version = 11 : i64} {
  func.func @_normalize_kernel(%arg0: i32, %arg1: memref<8x128xf32, #tpu.memory_space<vmem>>, %arg2: memref<1x128xf32, #tpu.memory_space<vmem>>, %arg3: memref<1x128xf32, #tpu.memory_space<vmem>>, %arg4: memref<8x128xf32, #tpu.memory_space<vmem>>) attributes {dimension_semantics = [#tpu.dimension_semantics<parallel>], iteration_bounds = array<i64: 1>, scalar_prefetch = 0 : i64, scratch_operands = 0 : i64, tpu.core_type = #tpu.core_type<tc>, window_params = [{transform_indices = @transform_0, window_bounds = array<i64: 8, 128>}, {pipeline_mode = #tpu.pipeline_mode<synchronous>, transform_indices = @transform_1, window_bounds = array<i64: 1, 128>}, {pipeline_mode = #tpu.pipeline_mode<synchronous>, transform_indices = @transform_2, window_bounds = array<i64: 1, 128>}, {transform_indices = @transform_3, window_bounds = array<i64: 8, 128>}]} {
    %c0 = arith.constant 0 : index
    %c0_0 = arith.constant 0 : index
    %0 = vector.load %arg1[%c0, %c0_0] : memref<8x128xf32, #tpu.memory_space<vmem>>, vector<8x128xf32>
    %c0_1 = arith.constant 0 : index
    %c0_2 = arith.constant 0 : index
    %1 = vector.load %arg2[%c0_1, %c0_2] : memref<1x128xf32, #tpu.memory_space<vmem>>, vector<1x128xf32>
    %2 = vector.broadcast %1 : vector<1x128xf32> to vector<8x128xf32>
    %3 = arith.mulf %0, %2 : vector<8x128xf32>
    %c0_3 = arith.constant 0 : index
    %c0_4 = arith.constant 0 : index
    %4 = vector.load %arg3[%c0_3, %c0_4] : memref<1x128xf32, #tpu.memory_space<vmem>>, vector<1x128xf32>
    %5 = vector.broadcast %4 : vector<1x128xf32> to vector<8x128xf32>
    %6 = arith.addf %3, %5 : vector<8x128xf32>
    %c0_5 = arith.constant 0 : index
    %c0_6 = arith.constant 0 : index
    %7 = vector.load %arg4[%c0_5, %c0_6] : memref<8x128xf32, #tpu.memory_space<vmem>>, vector<8x128xf32>
    tpu.vector_store %arg4[%c0_5, %c0_6], %6 {strides = array<i32>} : memref<8x128xf32, #tpu.memory_space<vmem>>, vector<8x128xf32>,
    return
  }
  func.func @transform_0(%arg0: i32) -> (i32, i32) {
    %c0_i32 = arith.constant 0 : i32
    %c0_i32_0 = arith.constant 0 : i32
    return %arg0, %c0_i32 : i32, i32
  }
  func.func @transform_1(%arg0: i32) -> (i32, i32) {
    %c0_i32 = arith.constant 0 : i32
    %c0_i32_0 = arith.constant 0 : i32
    %c0_i32_1 = arith.constant 0 : i32
    return %c0_i32, %c0_i32_0 : i32, i32
  }
  func.func @transform_2(%arg0: i32) -> (i32, i32) {
    %c0_i32 = arith.constant 0 : i32
    %c0_i32_0 = arith.constant 0 : i32
    %c0_i32_1 = arith.constant 0 : i32
    return %c0_i32, %c0_i32_0 : i32, i32
  }
  func.func @transform_3(%arg0: i32) -> (i32, i32) {
    %c0_i32 = arith.constant 0 : i32
    %c0_i32_0 = arith.constant 0 : i32
    return %arg0, %c0_i32 : i32, i32
  }
}

module attributes {stable_mosaic.version = 11 : i64} {
  func.func @kernel(%arg0: i32, %arg1: memref<8x128xf32, #tpu.memory_space<vmem>>, %arg2: memref<1x128xf32, #tpu.memory_space<vmem>>, %arg3: memref<1x128xf32, #tpu.memory_space<vmem>>, %arg4: memref<1x128xf32, #tpu.memory_space<vmem>>, %arg5: memref<1x128xf32, #tpu.memory_space<vmem>>, %arg6: memref<8x128xf32, #tpu.memory_space<vmem>>, %arg7: memref<8x128xf32, #tpu.memory_space<vmem>>, %arg8: memref<1xf32, #tpu.memory_space<smem>>) attributes {dimension_semantics = [#tpu.dimension_semantics<arbitrary>], iteration_bounds = array<i64: 1>, scalar_prefetch = 0 : i64, scratch_operands = 3 : i64, tpu.core_type = #tpu.core_type<tc>, window_params = [{transform_indices = @transform_0, window_bounds = array<i64: 8, 128>}, {pipeline_mode = #tpu.pipeline_mode<synchronous>, transform_indices = @transform_1, window_bounds = array<i64: 1, 128>}, {pipeline_mode = #tpu.pipeline_mode<synchronous>, transform_indices = @transform_2, window_bounds = array<i64: 1, 128>}, {pipeline_mode = #tpu.pipeline_mode<synchronous>, transform_indices = @transform_3, window_bounds = array<i64: 1, 128>}, {pipeline_mode = #tpu.pipeline_mode<synchronous>, transform_indices = @transform_4, window_bounds = array<i64: 1, 128>}]} {
    %c0 = arith.constant 0 : index
    %c0_0 = arith.constant 0 : index
    %0 = vector.load %arg1[%c0, %c0_0] : memref<8x128xf32, #tpu.memory_space<vmem>>, vector<8x128xf32>
    %1 = tpu.iota {dimensions = array<i32: 0>} : vector<8x128xi32>
    %c8_i32 = arith.constant 8 : i32
    %2 = arith.muli %arg0, %c8_i32 : i32
    %3 = vector.broadcast %2 : i32 to vector<8x128xi32>
    %4 = arith.addi %1, %3 : vector<8x128xi32>
    %c4_i32 = arith.constant 4 : i32
    %5 = vector.broadcast %c4_i32 : i32 to vector<8x128xi32>
    %6 = arith.cmpi slt, %4, %5 : vector<8x128xi32>
    %c0_i32 = arith.constant 0 : i32
    %7 = arith.cmpi eq, %arg0, %c0_i32 : i32
    %8 = arith.extui %7 : i1 to i32
    %c0_i32_1 = arith.constant 0 : i32
    %9 = arith.cmpi ne, %8, %c0_i32_1 : i32
    scf.if %9 {
      %cst_15 = arith.constant 0.000000e+00 : f32
      %29 = vector.broadcast %cst_15 : f32 to vector<8x128xf32>
      %c0_16 = arith.constant 0 : index
      %c0_17 = arith.constant 0 : index
      %30 = vector.load %arg6[%c0_16, %c0_17] : memref<8x128xf32, #tpu.memory_space<vmem>>, vector<8x128xf32>
      tpu.vector_store %arg6[%c0_16, %c0_17], %29 {strides = array<i32>} : memref<8x128xf32, #tpu.memory_space<vmem>>, vector<8x128xf32>,
      %cst_18 = arith.constant 0.000000e+00 : f32
      %31 = vector.broadcast %cst_18 : f32 to vector<8x128xf32>
      %c0_19 = arith.constant 0 : index
      %c0_20 = arith.constant 0 : index
      %32 = vector.load %arg7[%c0_19, %c0_20] : memref<8x128xf32, #tpu.memory_space<vmem>>, vector<8x128xf32>
      tpu.vector_store %arg7[%c0_19, %c0_20], %31 {strides = array<i32>} : memref<8x128xf32, #tpu.memory_space<vmem>>, vector<8x128xf32>,
      %cst_21 = arith.constant 0.000000e+00 : f32
      %33 = vector.broadcast %cst_21 : f32 to vector<8x128xf32>
      %34 = arith.select %6, %0, %33 : vector<8x128xi1>, vector<8x128xf32>
      %35 = vector.shape_cast %34 : vector<8x128xf32> to vector<1x8x128xf32>
      %cst_22 = arith.constant dense<0.000000e+00> : vector<1xf32>
      %36 = vector.multi_reduction <add>, %35, %cst_22 [1, 2] : vector<1x8x128xf32> to vector<1xf32>
      %37 = vector.shape_cast %36 : vector<1xf32> to vector<1x1x1xf32>
      %38 = vector.extract %37[0, 0, 0] : f32 from vector<1x1x1xf32>
      %cst_23 = arith.constant 5.120000e+02 : f32
      %39 = arith.divf %38, %cst_23 : f32
      %c0_24 = arith.constant 0 : index
      %40 = memref.load %arg8[%c0_24] : memref<1xf32, #tpu.memory_space<smem>>
      memref.store %39, %arg8[%c0_24] : memref<1xf32, #tpu.memory_space<smem>>
    } else {
    }
    %c0_2 = arith.constant 0 : index
    %10 = memref.load %arg8[%c0_2] : memref<1xf32, #tpu.memory_space<smem>>
    %11 = vector.broadcast %10 : f32 to vector<8x128xf32>
    %12 = arith.subf %0, %11 : vector<8x128xf32>
    %cst = arith.constant 0.000000e+00 : f32
    %13 = vector.broadcast %cst : f32 to vector<8x128xf32>
    %14 = arith.select %6, %12, %13 : vector<8x128xi1>, vector<8x128xf32>
    %c0_3 = arith.constant 0 : index
    %c0_4 = arith.constant 0 : index
    %15 = vector.load %arg6[%c0_3, %c0_4] : memref<8x128xf32, #tpu.memory_space<vmem>>, vector<8x128xf32>
    %16 = vector.shape_cast %14 : vector<8x128xf32> to vector<1x8x128xf32>
    %cst_5 = arith.constant dense<0.000000e+00> : vector<8x128xf32>
    %17 = vector.multi_reduction <add>, %16, %cst_5 [0] : vector<1x8x128xf32> to vector<8x128xf32>
    %18 = arith.addf %15, %17 : vector<8x128xf32>
    %c0_6 = arith.constant 0 : index
    %c0_7 = arith.constant 0 : index
    %19 = vector.load %arg6[%c0_6, %c0_7] : memref<8x128xf32, #tpu.memory_space<vmem>>, vector<8x128xf32>
    tpu.vector_store %arg6[%c0_6, %c0_7], %18 {strides = array<i32>} : memref<8x128xf32, #tpu.memory_space<vmem>>, vector<8x128xf32>,
    %c0_8 = arith.constant 0 : index
    %c0_9 = arith.constant 0 : index
    %20 = vector.load %arg7[%c0_8, %c0_9] : memref<8x128xf32, #tpu.memory_space<vmem>>, vector<8x128xf32>
    %21 = arith.mulf %14, %14 : vector<8x128xf32>
    %22 = vector.shape_cast %21 : vector<8x128xf32> to vector<1x8x128xf32>
    %cst_10 = arith.constant dense<0.000000e+00> : vector<8x128xf32>
    %23 = vector.multi_reduction <add>, %22, %cst_10 [0] : vector<1x8x128xf32> to vector<8x128xf32>
    %24 = arith.addf %20, %23 : vector<8x128xf32>
    %c0_11 = arith.constant 0 : index
    %c0_12 = arith.constant 0 : index
    %25 = vector.load %arg7[%c0_11, %c0_12] : memref<8x128xf32, #tpu.memory_space<vmem>>, vector<8x128xf32>
    tpu.vector_store %arg7[%c0_11, %c0_12], %24 {strides = array<i32>} : memref<8x128xf32, #tpu.memory_space<vmem>>, vector<8x128xf32>,
    %c0_i32_13 = arith.constant 0 : i32
    %26 = arith.cmpi eq, %arg0, %c0_i32_13 : i32
    %27 = arith.extui %26 : i1 to i32
    %c0_i32_14 = arith.constant 0 : i32
    %28 = arith.cmpi ne, %27, %c0_i32_14 : i32
    scf.if %28 {
      %c0_15 = arith.constant 0 : index
      %c0_16 = arith.constant 0 : index
      %29 = vector.load %arg6[%c0_15, %c0_16] : memref<8x128xf32, #tpu.memory_space<vmem>>, vector<8x128xf32>
      %30 = vector.shape_cast %29 : vector<8x128xf32> to vector<1x8x128xf32>
      %cst_17 = arith.constant dense<0.000000e+00> : vector<1xf32>
      %31 = vector.multi_reduction <add>, %30, %cst_17 [1, 2] : vector<1x8x128xf32> to vector<1xf32>
      %32 = vector.shape_cast %31 : vector<1xf32> to vector<1x1x1xf32>
      %33 = vector.extract %32[0, 0, 0] : f32 from vector<1x1x1xf32>
      %c0_18 = arith.constant 0 : index
      %c0_19 = arith.constant 0 : index
      %34 = vector.load %arg7[%c0_18, %c0_19] : memref<8x128xf32, #tpu.memory_space<vmem>>, vector<8x128xf32>
      %35 = vector.shape_cast %34 : vector<8x128xf32> to vector<1x8x128xf32>
      %cst_20 = arith.constant dense<0.000000e+00> : vector<1xf32>
      %36 = vector.multi_reduction <add>, %35, %cst_20 [1, 2] : vector<1x8x128xf32> to vector<1xf32>
      %37 = vector.shape_cast %36 : vector<1xf32> to vector<1x1x1xf32>
      %38 = vector.extract %37[0, 0, 0] : f32 from vector<1x1x1xf32>
      %cst_21 = arith.constant 5.120000e+02 : f32
      %39 = arith.divf %33, %cst_21 : f32
      %40 = arith.addf %10, %39 : f32
      %cst_22 = arith.constant 5.120000e+02 : f32
      %41 = arith.divf %38, %cst_22 : f32
      %42 = arith.mulf %39, %39 : f32
      %43 = arith.subf %41, %42 : f32
      %cst_23 = arith.constant 0.000000e+00 : f32
      %44 = arith.maximumf %43, %cst_23 : f32
      %cst_24 = arith.constant 1.000000e-07 : f32
      %45 = arith.addf %44, %cst_24 : f32
      %46 = math.rsqrt %45 : f32
      %c0_25 = arith.constant 0 : index
      %c0_26 = arith.constant 0 : index
      %47 = vector.load %arg2[%c0_25, %c0_26] : memref<1x128xf32, #tpu.memory_space<vmem>>, vector<1x128xf32>
      %c0_27 = arith.constant 0 : index
      %c0_28 = arith.constant 0 : index
      %48 = vector.load %arg3[%c0_27, %c0_28] : memref<1x128xf32, #tpu.memory_space<vmem>>, vector<1x128xf32>
      %49 = vector.broadcast %46 : f32 to vector<1x128xf32>
      %50 = arith.mulf %47, %49 : vector<1x128xf32>
      %c0_29 = arith.constant 0 : index
      %c0_30 = arith.constant 0 : index
      %51 = vector.load %arg4[%c0_29, %c0_30] : memref<1x128xf32, #tpu.memory_space<vmem>>, vector<1x128xf32>
      tpu.vector_store %arg4[%c0_29, %c0_30], %50 {strides = array<i32>} : memref<1x128xf32, #tpu.memory_space<vmem>>, vector<1x128xf32>,
      %52 = vector.broadcast %40 : f32 to vector<1x128xf32>
      %53 = arith.mulf %52, %50 : vector<1x128xf32>
      %54 = arith.subf %48, %53 : vector<1x128xf32>
      %c0_31 = arith.constant 0 : index
      %c0_32 = arith.constant 0 : index
      %55 = vector.load %arg5[%c0_31, %c0_32] : memref<1x128xf32, #tpu.memory_space<vmem>>, vector<1x128xf32>
      tpu.vector_store %arg5[%c0_31, %c0_32], %54 {strides = array<i32>} : memref<1x128xf32, #tpu.memory_space<vmem>>, vector<1x128xf32>,
    } else {
    }
    return
  }
  func.func @transform_0(%arg0: i32) -> (i32, i32) {
    %c0_i32 = arith.constant 0 : i32
    %c0_i32_0 = arith.constant 0 : i32
    return %arg0, %c0_i32 : i32, i32
  }
  func.func @transform_1(%arg0: i32) -> (i32, i32) {
    %c0_i32 = arith.constant 0 : i32
    %c0_i32_0 = arith.constant 0 : i32
    %c0_i32_1 = arith.constant 0 : i32
    return %c0_i32, %c0_i32_0 : i32, i32
  }
  func.func @transform_2(%arg0: i32) -> (i32, i32) {
    %c0_i32 = arith.constant 0 : i32
    %c0_i32_0 = arith.constant 0 : i32
    %c0_i32_1 = arith.constant 0 : i32
    return %c0_i32, %c0_i32_0 : i32, i32
  }
  func.func @transform_3(%arg0: i32) -> (i32, i32) {
    %c0_i32 = arith.constant 0 : i32
    %c0_i32_0 = arith.constant 0 : i32
    %c0_i32_1 = arith.constant 0 : i32
    return %c0_i32, %c0_i32_0 : i32, i32
  }
  func.func @transform_4(%arg0: i32) -> (i32, i32) {
    %c0_i32 = arith.constant 0 : i32
    %c0_i32_0 = arith.constant 0 : i32
    %c0_i32_1 = arith.constant 0 : i32
    return %c0_i32, %c0_i32_0 : i32, i32
  }
}

</mosaic_0001>

<bundles_post_ra>
// kernel: instant_layer_norm.3
= control target key start
LH: loop header
LB: loop body
LE: loop exit
PB: predicated region body
PF: predicated region fallthrough
CT: control target
= control target key end

     0   :  { %s70_s0 = inlined_call_operand.vmem [shape: f32[8,128], index: 0, kind: input, shape index: {}, may-alias: {0,3}]   ;;  %s71_s1 = inlined_call_operand.vmem [shape: f32[1,128], index: 1, kind: input, shape index: {}]   ;;  %s72_s2 = inlined_call_operand.vmem [shape: f32[1,128], index: 2, kind: input, shape index: {}]   ;;  %s73_s3 = inlined_call_operand.vmem [shape: f32[8,128], index: 3, kind: output, shape index: {}, may-alias: {0,3}]  }
   0x1   :  { %v14_v0 = vld [vmem:[%s70_s0] sm:$0xff] }
   0x2   :  { %v36_v1 = vld [vmem:[%s71_s1] ss:$0 sm:$0xff] }
   0x3   :  { %v37_v2 = vld [vmem:[%s72_s2] ss:$0 sm:$0xff]  ;;  %v22_v3 = vmul.f32 %v36_v1, %v14_v0 }
   0x5   :  { %v30_v4 = vadd.f32 %v37_v2, %v22_v3 }
   0x7   :  { %31 = vst [vmem:[%s73_s3] sm:$0xff] %v30_v4 }

// kernel: instant_layer_norm.2
= control target key start
LH: loop header
LB: loop body
LE: loop exit
PB: predicated region body
PF: predicated region fallthrough
CT: control target
= control target key end

     0   :  { %v17_v0 = vlaneseq  ;;  %s122_s24 = smov 0.0   ;;  %s170_s0 = inlined_call_operand.vmem [shape: f32[8,128], index: 0, kind: input, shape index: {}]   ;;  %s171_s1 = inlined_call_operand.vmem [shape: f32[1,128], index: 1, kind: input, shape index: {}]   ;;  %s172_s2 = inlined_call_operand.vmem [shape: f32[1,128], index: 2, kind: input, shape index: {}]   ;;  %s173_s3 = inlined_call_operand.vmem [shape: f32[1,128], index: 3, kind: output, shape index: {0}]   ;;  %s174_s4 = inlined_call_operand.vmem [shape: f32[1,128], index: 4, kind: output, shape index: {1}]  }
   0x1   :  { %v16_v1 = vld [vmem:[%s170_s0] sm:$0xff] }
   0x2   :  { %v18_v2 = vshrl.u32 %v17_v0, 7  ;;  %v94_v31 = vld [vmem:[%s171_s1] sm:$0x1] }
   0x3   :  { %v95_v35 = vld [vmem:[%s172_s2] sm:$0x1] }
   0x4   :  { %vm22_vm0 = vcmp.lt.s32.totalorder %v18_v2, 4 }
   0x5   :  { %v29_v3 = vsel %vm22_vm0, %v16_v1, 0.0 }
   0x6   :  { %30 = vadd.xlane.f32.xlu0 %v29_v3 }
  0x8f   :  { %v31_v4 = vpop.xlane.xlu0 %30 }
  0x90   :  { %v32_v5 = vrot.slane %v31_v4, 4 }
  0x92   :  { %v33_v6 = vadd.f32 %v32_v5, %v31_v4 }
  0x94   :  { %v34_v7 = vrot.slane %v33_v6, 2 }
  0x96   :  { %v35_v8 = vadd.f32 %v34_v7, %v33_v6 }
  0x98   :  { %v36_v9 = vrot.slane %v35_v8, 1 }
  0x9a   :  { %v37_v10 = vadd.f32 %v36_v9, %v35_v8 }
  0x9c   :  { %111 = vpush %v37_v10 }
  0xcd   :  { %s151_s17 = spop %111 }
  0xce   :  { %s41_s18 = smul.f32 0.001953125, %s151_s17 }
  0xd0   :  { %v45_v11 = vstv %s41_s18 }
  0xd1   :  { %v46_v12 = vsub.f32 %v16_v1, %v45_v11 }
  0xd3   :  { %v47_v13 = vsel %vm22_vm0, %v46_v12, 0.0 }
  0xd4   :  { %61 = vadd.xlane.f32.xlu0 %v47_v13  ;;  %v53_v14 = vmul.f32 %v47_v13, %v47_v13 }
  0xd6   :  { %71 = vadd.xlane.f32.xlu1 %v53_v14 }
 0x15d   :  { %v62_v15 = vpop.xlane.xlu0 %61 }
 0x15e   :  { %v63_v16 = vrot.slane %v62_v15, 4 }
 0x15f   :  { %v72_v17 = vpop.xlane.xlu1 %71 }
 0x160   :  { %v64_v18 = vadd.f32 %v63_v16, %v62_v15  ;;  %v73_v19 = vrot.slane %v72_v17, 4 }
 0x162   :  { %v65_v20 = vrot.slane %v64_v18, 2  ;;  %v74_v21 = vadd.f32 %v73_v19, %v72_v17 }
 0x164   :  { %v66_v22 = vadd.f32 %v65_v20, %v64_v18  ;;  %v75_v23 = vrot.slane %v74_v21, 2 }
 0x166   :  { %v76_v24 = vadd.f32 %v75_v23, %v74_v21  ;;  %v67_v25 = vrot.slane %v66_v22, 1 }
 0x168   :  { %v68_v26 = vadd.f32 %v67_v25, %v66_v22  ;;  %v77_v27 = vrot.slane %v76_v24, 1 }
 0x16a   :  { %113 = vpush %v68_v26  ;;  %v78_v28 = vadd.f32 %v77_v27, %v76_v24 }
 0x16c   :  { %115 = vpush %v78_v28 }
 0x19b   :  { %s114_s0 = spop %113 }
 0x19c   :  { %s82_s19 = smul.f32 0.001953125, %s114_s0 }
 0x19d   :  { %s116_s20 = spop %115 }
 0x19e   :  { %s87_s21 = smul.f32 %s82_s19, %s82_s19  ;;  %s83_s27 = sadd.f32 %s82_s19, %s41_s18 }
 0x19f   :  { %s86_s22 = smul.f32 0.001953125, %s116_s20 }
 0x1a0   :  { %v99_v34 = vstv %s83_s27 }
 0x1a1   :  { %s88_s23 = ssub.f32 %s86_s22, %s87_s21 }
 0x1a3   :  { %s89_s25 = smax.f32 %s122_s24, %s88_s23 }
 0x1a4   :  { %s90_s26 = sadd.f32 1e-07, %s89_s25 }
 0x1a6   :  { %v91_v29 = vstv %s90_s26 }
 0x1a7   :  { %120 = vrsqrt.f32 %v91_v29 }
 0x1b4   :  { %v121_v30 = vpop.eup %120 }
 0x1b5   :  { %117 = vpush %v121_v30 }
 0x1e6   :  { %s118_s30 = spop %117 }
 0x1e7   :  { %v96_v32 = vstv %s118_s30 }
 0x1e8   :  { %v97_v33 = vmul.f32 %v96_v32, %v94_v31 }
 0x1ea   :  { %98 = vst [vmem:[%s173_s3] sm:$0x1] %v97_v33  ;;  %v100_v36 = vmul.f32 %v99_v34, %v97_v33 }
 0x1ec   :  { %v101_v37 = vsub.f32 %v95_v35, %v100_v36 }
 0x1ee   :  { %102 = vst [vmem:[%s174_s4] sm:$0x1] %v101_v37 }

</bundles_post_ra>
